<compile_context>
chip_gen: v6e
topology: v6e:2x2x1
jax: 0.10.0
libtpu: 0.0.40
codegen_flags: <defaults>
</compile_context>

<pallas_src>
import jax
import jax.numpy as jnp
from jax.experimental import pallas as pl
from jax.experimental.pallas import tpu as pltpu

A_PAD = 128  # lane-dense padded action dimension


def _round_up(n, m):
    return ((n + m - 1) // m) * m


def policy_agent_kernel(x_ref, w1_ref, b1_ref, w2_ref, b2_ref, out_ref):
    # Hidden layer: bf16 MXU matmul, f32 accumulation; bias + ReLU in f32.
    h = jnp.dot(x_ref[...], w1_ref[...], preferred_element_type=jnp.float32)
    h = jnp.maximum(h + b1_ref[...], 0.0)

    # Output layer: bf16 MXU matmul into a lane-dense (TB, 128) logit slab.
    s = jnp.dot(h.astype(w2_ref.dtype), w2_ref[...],
                preferred_element_type=jnp.float32)
    s = s + b2_ref[...]  # padded lanes carry a -inf bias -> exp() == 0 there

    # Numerically stable softmax over the (padded) action axis.
    m = jnp.max(s, axis=-1, keepdims=True)
    e = jnp.exp(s - m)
    denom = jnp.sum(e, axis=-1, keepdims=True)
    out_ref[...] = e * pl.reciprocal(denom, approx=True)  # EUP vrcp, free slot


def policy_agent_forward(x, w1, b1, w2, b2, *, block_b=512):
    """softmax(relu(x @ w1 + b1) @ w2 + b2, axis=1) as one tiled Pallas call.

    x:  (B, obs_dim) f32   w1: (obs_dim, 24)   b1: (1, 24) or (24,)
    w2: (24, A)            b2: (1, A) or (A,)
    Returns (B, A) f32 action probabilities.
    """
    B, obs_dim = x.shape
    n_hid, A = w2.shape
    assert A <= A_PAD, "num_actions must fit in one 128-lane tile"

    # --- Lane-dense padding of the output head -----------------------------
    w2p = jnp.zeros((n_hid, A_PAD), jnp.bfloat16)
    w2p = w2p.at[:, :A].set(w2.astype(jnp.bfloat16))
    b2p = jnp.full((1, A_PAD), -jnp.inf, jnp.float32)
    b2p = b2p.at[:, :A].set(b2.reshape(1, A).astype(jnp.float32))

    # --- Batch tiling -------------------------------------------------------
    # TB multiple of 8 (sublane tile); tiles this small fit easily within the
    # v7x 32 MiB scoped-VMEM default even with double-buffered x/out.
    tb = min(block_b, _round_up(B, 8))
    b_pad = _round_up(B, tb)
    if b_pad != B:
        x = jnp.pad(x, ((0, b_pad - B), (0, 0)))

    xb = x.astype(jnp.bfloat16)
    w1b = w1.astype(jnp.bfloat16)
    b1f = b1.reshape(1, n_hid).astype(jnp.float32)

    grid = (pl.cdiv(b_pad, tb),)

    out = pl.pallas_call(
        policy_agent_kernel,
        out_shape=jax.ShapeDtypeStruct((b_pad, A_PAD), jnp.float32),
        grid=grid,
        in_specs=[
            # Streamed per batch tile.
            pl.BlockSpec((tb, obs_dim), lambda i: (i, 0)),
            # Weights/biases: constant index_map -> VMEM-resident across grid.
            pl.BlockSpec((obs_dim, n_hid), lambda i: (0, 0)),
            pl.BlockSpec((1, n_hid), lambda i: (0, 0)),
            pl.BlockSpec((n_hid, A_PAD), lambda i: (0, 0)),
            pl.BlockSpec((1, A_PAD), lambda i: (0, 0)),
        ],
        out_specs=pl.BlockSpec((tb, A_PAD), lambda i: (i, 0)),
        compiler_params=pltpu.CompilerParams(
            dimension_semantics=("parallel",),       # 2x on v7x (2 TCs)
            vmem_limit_bytes=32 * 1024 * 1024,       # plenty of headroom on v7x
        ),
    )(xb, w1b, b1f, w2p, b2p)

    return out[:B, :A]


def init_params(key, obs_dim, num_actions, n_hid=24):
    # Deterministic synthetic init (uniform, PyTorch-Linear-like bounds).
    k1, k2, k3, k4 = jax.random.split(key, 4)
    lim1 = 1.0 / jnp.sqrt(obs_dim)
    lim2 = 1.0 / jnp.sqrt(n_hid)
    w1 = jax.random.uniform(k1, (obs_dim, n_hid), jnp.float32, -lim1, lim1)
    b1 = jax.random.uniform(k2, (1, n_hid), jnp.float32, -lim1, lim1)
    w2 = jax.random.uniform(k3, (n_hid, num_actions), jnp.float32, -lim2, lim2)
    b2 = jax.random.uniform(k4, (1, num_actions), jnp.float32, -lim2, lim2)
    return w1, b1, w2, b2


if __name__ == "__main__":
    key = jax.random.PRNGKey(0)
    k_params, k_x, k_x2 = jax.random.split(key, 3)

    obs_dim = 16
    num_actions = 4
    w1, b1, w2, b2 = init_params(k_params, obs_dim, num_actions)

    def ref_forward(x):
        return jax.nn.softmax(jnp.maximum(x @ w1 + b1, 0.0) @ w2 + b2, axis=1)

    # Small, module-like shape (PolicyAgent.step on a couple of states).
    x_small = jax.random.normal(k_x, (2, obs_dim), jnp.float32)
    probs = policy_agent_forward(x_small, w1, b1, w2, b2)
    jax.block_until_ready(probs)
    assert probs.shape == (2, num_actions)
    assert jnp.allclose(jnp.sum(probs, axis=1), 1.0, atol=5e-3)
    assert jnp.allclose(probs, ref_forward(x_small), atol=2e-2)

    # Batched rollout path: exercises the multi-step batch grid + padding.
    x_big = jax.random.normal(k_x2, (1000, obs_dim), jnp.float32)
    probs_big = policy_agent_forward(x_big, w1, b1, w2, b2, block_b=256)
    jax.block_until_ready(probs_big)
    assert probs_big.shape == (1000, num_actions)
    assert jnp.allclose(jnp.sum(probs_big, axis=1), 1.0, atol=5e-3)
    assert jnp.allclose(probs_big, ref_forward(x_big), atol=2e-2)

    print("KERNEL_OK")
</pallas_src>

<mosaic_0001>
module attributes {stable_mosaic.version = 11 : i64} {
  func.func @policy_agent_kernel(%arg0: i32, %arg1: memref<8x16xbf16, #tpu.memory_space<vmem>>, %arg2: memref<16x24xbf16, #tpu.memory_space<vmem>>, %arg3: memref<1x24xf32, #tpu.memory_space<vmem>>, %arg4: memref<24x128xbf16, #tpu.memory_space<vmem>>, %arg5: memref<1x128xf32, #tpu.memory_space<vmem>>, %arg6: memref<8x128xf32, #tpu.memory_space<vmem>>) attributes {dimension_semantics = [#tpu.dimension_semantics<parallel>], iteration_bounds = array<i64: 1>, scalar_prefetch = 0 : i64, scratch_operands = 0 : i64, tpu.core_type = #tpu.core_type<tc>, window_params = [{transform_indices = @transform_0, window_bounds = array<i64: 8, 16>}, {pipeline_mode = #tpu.pipeline_mode<synchronous>, transform_indices = @transform_1, window_bounds = array<i64: 16, 24>}, {pipeline_mode = #tpu.pipeline_mode<synchronous>, transform_indices = @transform_2, window_bounds = array<i64: 1, 24>}, {pipeline_mode = #tpu.pipeline_mode<synchronous>, transform_indices = @transform_3, window_bounds = array<i64: 24, 128>}, {pipeline_mode = #tpu.pipeline_mode<synchronous>, transform_indices = @transform_4, window_bounds = array<i64: 1, 128>}, {transform_indices = @transform_5, window_bounds = array<i64: 8, 128>}]} {
    %c0 = arith.constant 0 : index
    %c0_0 = arith.constant 0 : index
    %0 = vector.load %arg1[%c0, %c0_0] : memref<8x16xbf16, #tpu.memory_space<vmem>>, vector<8x16xbf16>
    %c0_1 = arith.constant 0 : index
    %c0_2 = arith.constant 0 : index
    %1 = vector.load %arg2[%c0_1, %c0_2] : memref<16x24xbf16, #tpu.memory_space<vmem>>, vector<16x24xbf16>
    %cst = arith.constant dense<0.000000e+00> : vector<8x24xf32>
    %2 = tpu.matmul %0, %1, %cst {dimension_numbers = #tpu.dot_dimension_numbers<[1], [0], [0], [1], [0, 0, 1, 1], [], []>} : vector<8x16xbf16>, vector<16x24xbf16>, vector<8x24xf32> -> vector<8x24xf32>
    %c0_3 = arith.constant 0 : index
    %c0_4 = arith.constant 0 : index
    %3 = vector.load %arg3[%c0_3, %c0_4] : memref<1x24xf32, #tpu.memory_space<vmem>>, vector<1x24xf32>
    %4 = vector.broadcast %3 : vector<1x24xf32> to vector<8x24xf32>
    %5 = arith.addf %2, %4 : vector<8x24xf32>
    %cst_5 = arith.constant 0.000000e+00 : f32
    %6 = vector.broadcast %cst_5 : f32 to vector<8x24xf32>
    %7 = arith.maximumf %5, %6 : vector<8x24xf32>
    %8 = arith.truncf %7 : vector<8x24xf32> to vector<8x24xbf16>
    %c0_6 = arith.constant 0 : index
    %c0_7 = arith.constant 0 : index
    %9 = vector.load %arg4[%c0_6, %c0_7] : memref<24x128xbf16, #tpu.memory_space<vmem>>, vector<24x128xbf16>
    %cst_8 = arith.constant dense<0.000000e+00> : vector<8x128xf32>
    %10 = tpu.matmul %8, %9, %cst_8 {dimension_numbers = #tpu.dot_dimension_numbers<[1], [0], [0], [1], [0, 0, 1, 1], [], []>} : vector<8x24xbf16>, vector<24x128xbf16>, vector<8x128xf32> -> vector<8x128xf32>
    %c0_9 = arith.constant 0 : index
    %c0_10 = arith.constant 0 : index
    %11 = vector.load %arg5[%c0_9, %c0_10] : memref<1x128xf32, #tpu.memory_space<vmem>>, vector<1x128xf32>
    %12 = vector.broadcast %11 : vector<1x128xf32> to vector<8x128xf32>
    %13 = arith.addf %10, %12 : vector<8x128xf32>
    %cst_11 = arith.constant dense<0xFF800000> : vector<8xf32>
    %14 = vector.multi_reduction <maximumf>, %13, %cst_11 [1] : vector<8x128xf32> to vector<8xf32>
    %15 = vector.shape_cast %14 : vector<8xf32> to vector<8x1xf32>
    %16 = vector.broadcast %15 : vector<8x1xf32> to vector<8x128xf32>
    %17 = arith.subf %13, %16 : vector<8x128xf32>
    %18 = math.exp %17 : vector<8x128xf32>
    %cst_12 = arith.constant dense<0.000000e+00> : vector<8xf32>
    %19 = vector.multi_reduction <add>, %18, %cst_12 [1] : vector<8x128xf32> to vector<8xf32>
    %20 = vector.shape_cast %19 : vector<8xf32> to vector<8x1xf32>
    %21 = tpu.reciprocal %20 {approx = true} : vector<8x1xf32> -> vector<8x1xf32>
    %22 = vector.broadcast %21 : vector<8x1xf32> to vector<8x128xf32>
    %23 = arith.mulf %18, %22 : vector<8x128xf32>
    %c0_13 = arith.constant 0 : index
    %c0_14 = arith.constant 0 : index
    %24 = vector.load %arg6[%c0_13, %c0_14] : memref<8x128xf32, #tpu.memory_space<vmem>>, vector<8x128xf32>
    tpu.vector_store %arg6[%c0_13, %c0_14], %23 {strides = array<i32>} : memref<8x128xf32, #tpu.memory_space<vmem>>, vector<8x128xf32>,
    return
  }
  func.func @transform_0(%arg0: i32) -> (i32, i32) {
    %c0_i32 = arith.constant 0 : i32
    %c0_i32_0 = arith.constant 0 : i32
    return %arg0, %c0_i32 : i32, i32
  }
  func.func @transform_1(%arg0: i32) -> (i32, i32) {
    %c0_i32 = arith.constant 0 : i32
    %c0_i32_0 = arith.constant 0 : i32
    %c0_i32_1 = arith.constant 0 : i32
    return %c0_i32, %c0_i32_0 : i32, i32
  }
  func.func @transform_2(%arg0: i32) -> (i32, i32) {
    %c0_i32 = arith.constant 0 : i32
    %c0_i32_0 = arith.constant 0 : i32
    %c0_i32_1 = arith.constant 0 : i32
    return %c0_i32, %c0_i32_0 : i32, i32
  }
  func.func @transform_3(%arg0: i32) -> (i32, i32) {
    %c0_i32 = arith.constant 0 : i32
    %c0_i32_0 = arith.constant 0 : i32
    %c0_i32_1 = arith.constant 0 : i32
    return %c0_i32, %c0_i32_0 : i32, i32
  }
  func.func @transform_4(%arg0: i32) -> (i32, i32) {
    %c0_i32 = arith.constant 0 : i32
    %c0_i32_0 = arith.constant 0 : i32
    %c0_i32_1 = arith.constant 0 : i32
    return %c0_i32, %c0_i32_0 : i32, i32
  }
  func.func @transform_5(%arg0: i32) -> (i32, i32) {
    %c0_i32 = arith.constant 0 : i32
    %c0_i32_0 = arith.constant 0 : i32
    return %arg0, %c0_i32 : i32, i32
  }
}

</mosaic_0001>

<bundles_post_ra>
// kernel: tpu_custom_call.1
= control target key start
LH: loop header
LB: loop body
LE: loop exit
PB: predicated region body
PF: predicated region fallthrough
CT: control target
= control target key end

     0   :  { %10 = vsyncpa [#allocation3], 0  ;;  %s399_s0 = inlined_call_operand.hbm [shape: bf16[8,16], index: 0, kind: input, shape index: {}]   ;;  %s400_s1 = inlined_call_operand.hbm [shape: bf16[16,24], index: 1, kind: input, shape index: {}]   ;;  %s401_s2 = inlined_call_operand.vmem [shape: f32[1,24], index: 2, kind: input, shape index: {}]   ;;  %s402_s3 = inlined_call_operand.hbm [shape: bf16[24,128], index: 3, kind: input, shape index: {}]   ;;  %s403_s4 = inlined_call_operand.vmem [shape: f32[1,128], index: 4, kind: input, shape index: {}]   ;;  %s404_s5 = inlined_call_operand.hbm [shape: f32[8,128], index: 5, kind: output, shape index: {}]  }
   0x1   :  { %11 = vsyncpa [#allocation6], 0 }
   0x2   :  { %12 = vsyncpa [#allocation4], 0  ;;  %s343_s18 = smov [#allocation5]  }
   0x3   :  { %s28_s19 = sshll.u32 %s343_s18, 4  ;;  %s29_s19 = int_to_ptr.vmem [resolvable:$true] %s28_s19 }
   0x4   :  { %s265_s20 = scalar_lea.vmem %s29_s19, 128  ;;  %p270_p1 = scmp.lt.s32.totalorder %s29_s19, %s29_s19 }
   0x5   :  { %p266_p0 = scmp.ne.s32.totalorder %s29_s19, %s265_s20  ;;  %p271_p2 = scmp.lt.s32.totalorder %s265_s20, %s265_s20 }
   0x7   :  { %p272_p3 = por %p271_p2, %p270_p1 }
   0x9   :  { %p273_p4 = pnand %p272_p3, %p266_p0 }
   0xb   :  { %276 = shalt.err (!%p273_p4)
}
   0xc   :  { %s344_s21 = smov 64   ;;  %s345_s22 = smov 4  }
   0xd   :  { %34 = dma.hbm_to_vmem [thread:$0]  %s400_s1, 128, %s29_s19, [#allocation6], %s344_s21, %s344_s21, %s345_s22  }
   0xe   :  { %s346_s25 = smov [#allocation2]   ;;  %s347_s27 = smov [#allocation7]  }
   0xf   :  { %s19_s26 = sshll.u32 %s346_s25, 4  ;;  %s42_s28 = sshll.u32 %s347_s27, 4  ;;  %s20_s26 = int_to_ptr.vmem [resolvable:$true] %s19_s26  ;;  %s43_s28 = int_to_ptr.vmem [resolvable:$true] %s42_s28 }
  0x10   :  { %s285_s29 = scalar_lea.vmem %s20_s26, 64  ;;  %p290_p6 = scmp.lt.s32.totalorder %s20_s26, %s20_s26 }
  0x11   :  { %p286_p5 = scmp.ne.s32.totalorder %s20_s26, %s285_s29  ;;  %p291_p7 = scmp.lt.s32.totalorder %s285_s29, %s285_s29 }
  0x13   :  { %p292_p8 = por %p291_p7, %p290_p6 }
  0x15   :  { %p293_p9 = pnand %p292_p8, %p286_p5 }
  0x17   :  { %296 = shalt.err (!%p293_p9)
}
  0x18   :  { %22 = dma.hbm_to_vmem [thread:$0]  %s399_s0, 64, %s20_s26, [#allocation3]  }
  0x19   :  { %s305_s7 = scalar_lea.vmem %s43_s28, 192  ;;  %p310_p11 = scmp.lt.s32.totalorder %s43_s28, %s43_s28 }
  0x1a   :  { %p306_p10 = scmp.ne.s32.totalorder %s43_s28, %s305_s7  ;;  %p311_p12 = scmp.lt.s32.totalorder %s305_s7, %s305_s7 }
  0x1c   :  { %p312_p13 = por %p311_p12, %p310_p11 }
  0x1e   :  { %p313_p0 = pnand %p312_p13, %p306_p10 }
  0x20   :  { %316 = shalt.err (!%p313_p0)
}
  0x21   :  { %48 = dma.hbm_to_vmem [thread:$0]  %s402_s3, 192, %s43_s28, [#allocation6], %s344_s21, %s344_s21, %s345_s22  }
  0x22   :  { %337 = dma.done.wait [#allocation3], 64  }
  0x23   :  { %338 = vsyncadd [#allocation3], 4294967232 }
  0x24   :  { %339 = dma.done.wait [#allocation6], 320  }
  0x25   :  { %340 = vsyncadd [#allocation6], 4294966976  ;;  %v348_v0 = vmov 0.0   ;;  %vm349_vm0 = vmmov 0   ;;  %v250_v1 = vld [vmem:[#allocation5] sm:$0xff]   ;;  %vm77_vm1 = vcmask 130048  }
  0x26   :  { %228 = vmatprep.subr.bf16.mxu0 %v348_v0  ;;  %230 = vmatprep.mubr.msk.bf16.mxu0 %vm349_vm0, %v348_v0  ;;  %v61_v2 = vld [vmem:[#allocation2] sm:$0xf]  ;;  %v251_v3 = vld [vmem:[#allocation7 + $0x8] ss:$0 sps:$4 sm:$0xff]   ;;  %vm146_vm2 = vcmask 1043456   ;;  %v252_v5 = vld [vmem:[#allocation7] sm:$0xff]  }
  0x27   :  { %234 = vmatprep.subr.bf16.mxu1 %v348_v0  ;;  %238 = vmatprep.mubr.msk.bf16.mxu1 %vm349_vm0, %v348_v0  ;;  %v148_v4 = vsel %vm146_vm2, %v251_v3, 0  ;;  %v216_v6 = vld [vmem:[%s401_s2] ss:$0 sm:$0xff]  ;;  %vm142_vm3 = vcmask 195584   ;;  %s350_s2 = smov [#allocation8]  }
  0x28   :  { %229 = vmatpush3.bf16.msra.mxu0 %v250_v1  ;;  %235 = vmatpush3.bf16.msra.mxu1 %v148_v4  ;;  %v219_v14 = vld [vmem:[%s403_s4] ss:$0 sm:$0xff]  ;;  %s206_s11 = sshll.u32 %s350_s2, 4  ;;  %s207_s11 = int_to_ptr.vmem [resolvable:$true] %s206_s11 }
  0x29   :  { %236 = vmatprep.subr.bf16.mxu1 %v348_v0  ;;  %s317_s4 = scalar_lea.vmem %s207_s11, 128  ;;  %p322_p2 = scmp.lt.s32.totalorder %s207_s11, %s207_s11 }
  0x2a   :  { %p318_p1 = scmp.ne.s32.totalorder %s207_s11, %s317_s4  ;;  %p323_p3 = scmp.lt.s32.totalorder %s317_s4, %s317_s4 }
  0x2b   :  { %231 = vmatmul.mubr.msk.bf16.vlgmr.msra.gmra.mxu0 %vm77_vm1, %v61_v2 }
  0x2c   :  { %237 = vmatpush3.bf16.msra.mxu1 %v252_v5  ;;  %p324_p4 = por %p323_p3, %p322_p2 }
  0x2e   :  { %p325_p5 = pnand %p324_p4, %p318_p1 }
  0xeb   :  { %v115_v7 = vpop.f32.mrf.mxu0 }
  0xec   :  { %v116_v8 = vadd.f32 %v216_v6, %v115_v7 }
  0xed   :  { %v232_v9 = vpop.f32.mrf.mxu0 }
  0xee   :  { %v121_v10 = vmax.f32 %v116_v8, 0.0 }
  0xef   :  { %v118_v11 = vpop.f32.mrf.mxu0 }
  0xf0   :  { %v122_v12 = vpack.c.bf16 %v121_v10, %v121_v10 }
  0xf1   :  { %v233_v13 = vpop.f32.mrf.mxu0 }
  0xf2   :  { %239 = vmatmul.mubr.msk.bf16.vlgmr.msra.gmra.mxu1 %vm142_vm3, %v122_v12 }
 0x1b2   :  { %v184_v15 = vpop.f32.mrf.mxu1 }
 0x1b3   :  { %v185_v16 = vadd.f32 %v219_v14, %v184_v15 }
 0x1b4   :  { %v240_v17 = vpop.f32.mrf.mxu1 }
 0x1b5   :  { %190 = vmax.xlane.f32.xlu0 %v185_v16 }
 0x1b6   :  { %v187_v18 = vpop.f32.mrf.mxu1 }
 0x1b8   :  { %v241_v19 = vpop.f32.mrf.mxu1 }
 0x23e   :  { %v191_v20 = vpop.xlane.xlu0 %190 }
 0x23f   :  { %v192_v21 = vsub.f32 %v185_v16, %v191_v20 }
 0x241   :  { %v193_v22 = vmul.f32 1.442695, %v192_v21 }
 0x243   :  { %253 = vpow2.f32 %v193_v22 }
 0x250   :  { %v254_v23 = vpop.eup %253 }
 0x251   :  { %195 = vadd.xlane.f32.xlu0 %v254_v23 }
 0x2da   :  { %v196_v24 = vpop.xlane.xlu0 %195 }
 0x2db   :  { %255 = vrcp.f32 %v196_v24 }
 0x2e8   :  { %v256_v25 = vpop.eup %255 }
 0x2e9   :  { %v198_v26 = vmul.f32 %v256_v25, %v254_v23 }
 0x2eb   :  { %199 = vst [vmem:[#allocation8] sm:$0xff] %v198_v26 }
 0x2ec   :  { %328 = shalt.err (!%p325_p5)
}
 0x2ed   :  { %209 = dma.vmem_to_hbm [thread:$0]  %s207_s11, 128, %s404_s5, [#allocation4]  }
 0x2ee   :  { %341 = dma.done.wait [#allocation4], 128  }
 0x2ef   :  { %342 = vsyncadd [#allocation4], 4294967168 }
 0x2f0   :  { %213 = vsyncpa [#allocation3], 1 }
 0x2f1   :  { %214 = vsyncpa [#allocation6], 1 }
 0x2f2   :  { %215 = vsyncpa [#allocation4], 1 }

</bundles_post_ra>
